<compile_context>
chip_gen: v7x
topology: tpu7x:2x2x1
jax: 0.10.0
libtpu: 0.0.40
codegen_flags: <defaults>
</compile_context>

<pallas_src>
import math
import functools

import jax
import jax.numpy as jnp
from jax.experimental import pallas as pl
from jax.experimental.pallas import tpu as pltpu

LN_EPS = 1e-5
INV_SQRT2 = 1.0 / math.sqrt(2.0)


def _round_up(a, m):
    return ((a + m - 1) // m) * m


def _gelu_exact(u):
    # Exact (erf) GELU — matches torch.nn.functional.gelu default.
    return 0.5 * u * (1.0 + jax.lax.erf(u * INV_SQRT2))


def _physical_vmem_bytes():
    """Physical VMEM per TensorCore; conservative 64 MiB fallback (v7x floor)."""
    try:
        cap = getattr(pltpu.get_tpu_info(), "vmem_capacity_bytes", None)
        if cap:
            return int(cap)
    except Exception:
        pass
    return 64 * 1024 * 1024


def fused_residual_mlp_kernel(x_ref, lnp_ref, w1_ref, w2_ref, o_ref,
                              acc_ref, z_ref, *, d_actual):
    """Grid = (token_tiles, L, h_chunks); layer & chunk axes innermost ("arbitrary").

    x_ref:   (TILE_N, d_pad)        input token tile (read only at l==0, c==0)
    lnp_ref: (1, 3, d_pad)          rows: gamma, beta, b2 of layer l
    w1_ref:  (1, d_pad, h_chunk)    fc1 weight chunk of layer l, stored (in, out)
    w2_ref:  (1, h_chunk, d_pad)    fc2 weight chunk of layer l, stored (in, out)
    o_ref:   (TILE_N, d_pad)        output tile (written at last layer/chunk)
    acc_ref: (TILE_N, d_pad) f32    activation carry across layers (scratch)
    z_ref:   (TILE_N, d_pad) wdtype LayerNorm output of the current layer (scratch)
    """
    l = pl.program_id(1)
    c = pl.program_id(2)
    last_l = pl.num_programs(1) - 1
    last_c = pl.num_programs(2) - 1

    @pl.when(jnp.logical_and(l == 0, c == 0))
    def _():
        acc_ref[...] = x_ref[...].astype(jnp.float32)

    # --- LayerNorm, once per layer (c == 0).  Padded columns of acc are exactly
    # zero by construction (zero-padded x, weights, gamma/beta/b2), so unmasked
    # one-pass sums divided by the real width d are exact. ---
    @pl.when(c == 0)
    def _():
        x = acc_ref[...]                                  # (TILE_N, d_pad) f32
        inv_d = 1.0 / d_actual
        s1 = jnp.sum(x, axis=-1, keepdims=True)
        s2 = jnp.sum(x * x, axis=-1, keepdims=True)
        mean = s1 * inv_d
        var = jnp.maximum(s2 * inv_d - mean * mean, 0.0)
        ln = lnp_ref[0]                                   # (3, d_pad)
        gamma = ln[0:1, :].astype(jnp.float32)
        beta = ln[1:2, :].astype(jnp.float32)
        z = (x - mean) * jax.lax.rsqrt(var + LN_EPS) * gamma + beta
        z_ref[...] = z.astype(z_ref.dtype)                # narrow operand for the MXU

    # --- fc1 chunk -> gelu -> fc2 chunk, accumulated into the f32 carry ---
    u = jnp.dot(z_ref[...], w1_ref[0], preferred_element_type=jnp.float32)
    g = _gelu_exact(u)
    acc_ref[...] += jnp.dot(g.astype(w2_ref.dtype), w2_ref[0],
                            preferred_element_type=jnp.float32)

    @pl.when(c == last_c)
    def _():
        acc_ref[...] += lnp_ref[0][2:3, :].astype(jnp.float32)   # fc2 bias

    @pl.when(jnp.logical_and(l == last_l, c == last_c))
    def _():
        o_ref[...] = acc_ref[...].astype(o_ref.dtype)


def prepare_params(params, weight_dtype=jnp.bfloat16, h_chunk_target=2048,
                   weight_chunk_vmem_budget=16 * 1024 * 1024):
    """One-time pack/pad/cast of all layer parameters (do NOT call per forward)."""
    d = params[0]["w1"].shape[0]
    h = params[0]["w1"].shape[1]
    d_pad = _round_up(d, 128)
    h_pad = _round_up(h, 128)
    wb = jnp.dtype(weight_dtype).itemsize

    # Hidden-dim chunk: as wide as possible (MXU N dim) while keeping the
    # double-buffered (d_pad,h_chunk)+(h_chunk,d_pad) weight chunks inside a
    # conservative VMEM budget valid on every generation (incl. 64 MiB v7x).
    max_by_budget = (weight_chunk_vmem_budget // (4 * d_pad * wb)) // 128 * 128
    h_chunk = max(128, min(h_pad, h_chunk_target, max(128, max_by_budget)))
    h_pad = _round_up(h_pad, h_chunk)   # pad hidden dim up to a chunk multiple

    w1 = jnp.stack([jnp.asarray(p["w1"], weight_dtype) for p in params])   # (L, d, h)
    w1 = jnp.pad(w1, ((0, 0), (0, d_pad - d), (0, h_pad - h)))
    w2 = jnp.stack([jnp.asarray(p["w2"], weight_dtype) for p in params])   # (L, h, d)
    w2 = jnp.pad(w2, ((0, 0), (0, h_pad - h), (0, d_pad - d)))

    def vec(p, name):
        return jnp.asarray(p[name], weight_dtype).reshape(1, d)

    lnp = jnp.stack([jnp.concatenate([vec(p, "gamma"), vec(p, "beta"), vec(p, "b2")],
                                     axis=0) for p in params])              # (L, 3, d)
    lnp = jnp.pad(lnp, ((0, 0), (0, 0), (0, d_pad - d)))

    return dict(lnp=lnp, w1=w1, w2=w2, h_chunk=h_chunk)


@functools.partial(jax.jit, static_argnames=("h_chunk",))
def _forward_jit(x, lnp, w1, w2, *, h_chunk):
    B, S, d = x.shape
    L, d_pad, h_pad = w1.shape
    n_h_chunks = h_pad // h_chunk
    dtype = x.dtype
    xb = jnp.dtype(dtype).itemsize
    wb = jnp.dtype(w1.dtype).itemsize

    N = B * S
    n_rows = _round_up(N, 8)

    vmem_cap = _physical_vmem_bytes()
    budget = int(vmem_cap * 0.8)

    # Small workloads: cap the tile so we get >= 2 token tiles (lets the
    # "parallel" grid axis shard across the two v7x TensorCores).
    tile_cap = _round_up(-(-N // 2), 8) if n_rows >= 16 else n_rows

    def vmem_est(tile):
        return (4 * d_pad * h_chunk * wb          # w1 + w2 chunks, double-buffered
                + 2 * 2 * 8 * d_pad * wb          # gamma/beta/b2 pack (padded to 8 rows)
                + 2 * 2 * tile * d_pad * xb       # x + out blocks, double-buffered
                + tile * d_pad * (4 + wb)         # f32 carry + z scratch
                + 3 * tile * h_chunk * 4)         # u / gelu temporaries

    tile_eff = 8
    for cand in (768, 640, 512, 384, 256, 128, 64, 8):
        t = max(8, min(cand, tile_cap))
        if vmem_est(t) <= budget:
            tile_eff = t
            break

    N_pad = _round_up(N, tile_eff)
    x2d = jnp.pad(x.reshape(N, d), ((0, N_pad - N), (0, d_pad - d)))

    vmem_limit = int(min(int(vmem_cap * 0.9),
                         max(32 * 1024 * 1024, (vmem_est(tile_eff) * 5) // 4)))

    kernel = functools.partial(fused_residual_mlp_kernel, d_actual=d)
    grid = (N_pad // tile_eff, L, n_h_chunks)

    out = pl.pallas_call(
        kernel,
        out_shape=jax.ShapeDtypeStruct((N_pad, d_pad), dtype),
        grid_spec=pltpu.PrefetchScalarGridSpec(
            num_scalar_prefetch=0,
            grid=grid,
            in_specs=[
                pl.BlockSpec((tile_eff, d_pad), lambda i, l, c: (i, 0)),       # x tile
                pl.BlockSpec((1, 3, d_pad), lambda i, l, c: (l, 0, 0)),        # gamma/beta/b2
                pl.BlockSpec((1, d_pad, h_chunk), lambda i, l, c: (l, 0, c)),  # w1 chunk
                pl.BlockSpec((1, h_chunk, d_pad), lambda i, l, c: (l, c, 0)),  # w2 chunk
            ],
            out_specs=pl.BlockSpec((tile_eff, d_pad), lambda i, l, c: (i, 0)),
            scratch_shapes=[pltpu.VMEM((tile_eff, d_pad), jnp.float32),
                            pltpu.VMEM((tile_eff, d_pad), w1.dtype)],
        ),
        input_output_aliases={0: 0},   # x read only at layer 0; out written only at the end
        compiler_params=pltpu.CompilerParams(
            dimension_semantics=("parallel", "arbitrary", "arbitrary"),
            vmem_limit_bytes=vmem_limit,
        ),
    )(x2d, lnp, w1, w2)

    return out[:N, :d].reshape(B, S, d)


def residual_mlp_forward(x, packed):
    """ResidualMLP forward.  x: (batch, seq, d); packed: output of prepare_params()."""
    return _forward_jit(x, packed["lnp"], packed["w1"], packed["w2"],
                        h_chunk=packed["h_chunk"])


def init_params(key, d, L, dtype=jnp.float32):
    """Deterministic parameter init (PyTorch-style uniform bounds)."""
    h = 4 * d
    params = []
    for _ in range(L):
        k1, k2, k3, key = jax.random.split(key, 4)
        bound1 = 1.0 / math.sqrt(d)   # fc1: in_features = d
        bound2 = 1.0 / math.sqrt(h)   # fc2: in_features = h
        # Stored (in, out) so the kernel computes z @ W == F.linear(z, W_torch).
        w1 = jax.random.uniform(k1, (d, h), dtype, minval=-bound1, maxval=bound1)
        w2 = jax.random.uniform(k2, (h, d), dtype, minval=-bound2, maxval=bound2)
        b2 = jax.random.uniform(k3, (1, d), dtype, minval=-bound2, maxval=bound2)
        gamma = jnp.ones((1, d), dtype)   # LayerNorm default affine params
        beta = jnp.zeros((1, d), dtype)
        params.append(dict(gamma=gamma, beta=beta, w1=w1, w2=w2, b2=b2))
    return params


def reference_forward(x, params):
    """Pure-JAX reference for sanity checking."""
    B, S, d = x.shape
    y = x.reshape(B * S, d).astype(jnp.float32)
    for p in params:
        mean = jnp.mean(y, axis=-1, keepdims=True)
        var = jnp.mean((y - mean) ** 2, axis=-1, keepdims=True)
        z = (y - mean) / jnp.sqrt(var + LN_EPS)
        z = z * p["gamma"] + p["beta"]
        u = z @ p["w1"]
        hh = 0.5 * u * (1.0 + jax.lax.erf(u * INV_SQRT2))
        y = y + hh @ p["w2"] + p["b2"]
    return y.reshape(B, S, d)


# TODO(synk): the DebiasGate / ActDebiasGate scaling only affects the backward pass
# (identity in forward), so it is intentionally not represented in this kernel.

if __name__ == "__main__":
    key = jax.random.PRNGKey(0)
    B, S, d, L = 2, 8, 32, 2   # batch=2, seq=8, hidden d=32, 2 residual blocks

    kx, kp = jax.random.split(key)
    x = jax.random.normal(kx, (B, S, d), jnp.float32)
    params = init_params(kp, d, L)
    ref = reference_forward(x, params)

    # f32-weight path: tight numerical check of the kernel math.
    packed_f32 = prepare_params(params, weight_dtype=jnp.float32)
    out_f32 = jax.block_until_ready(residual_mlp_forward(x, packed_f32))
    assert out_f32.shape == (B, S, d)
    assert jnp.allclose(out_f32, ref, atol=2e-4, rtol=2e-4), "f32 mismatch vs reference"

    # bf16-weight path (default / performance path): looser tolerance.
    packed_bf16 = prepare_params(params)
    out_bf16 = jax.block_until_ready(residual_mlp_forward(x, packed_bf16))
    assert out_bf16.shape == (B, S, d)
    assert jnp.allclose(out_bf16, ref, atol=5e-2, rtol=5e-2), "bf16 mismatch vs reference"

    print("KERNEL_OK")
</pallas_src>

<mosaic_0001>
module attributes {stable_mosaic.version = 11 : i64} {
  func.func @fused_residual_mlp_kernel(%arg0: i32, %arg1: i32, %arg2: i32, %arg3: memref<8x128xf32, #tpu.memory_space<vmem>>, %arg4: memref<1x3x128xf32, #tpu.memory_space<vmem>>, %arg5: memref<1x128x128xf32, #tpu.memory_space<vmem>>, %arg6: memref<1x128x128xf32, #tpu.memory_space<vmem>>, %arg7: memref<8x128xf32, #tpu.memory_space<vmem>>, %arg8: memref<8x128xf32, #tpu.memory_space<vmem>>, %arg9: memref<8x128xf32, #tpu.memory_space<vmem>>) attributes {dimension_semantics = [#tpu.dimension_semantics<parallel>, #tpu.dimension_semantics<arbitrary>, #tpu.dimension_semantics<arbitrary>], iteration_bounds = array<i64: 2, 2, 1>, scalar_prefetch = 0 : i64, scratch_operands = 2 : i64, tpu.core_type = #tpu.core_type<tc>, window_params = [{transform_indices = @transform_0, window_bounds = array<i64: 8, 128>}, {transform_indices = @transform_1, window_bounds = array<i64: 1, 3, 128>}, {transform_indices = @transform_2, window_bounds = array<i64: 1, 128, 128>}, {transform_indices = @transform_3, window_bounds = array<i64: 1, 128, 128>}, {transform_indices = @transform_4, window_bounds = array<i64: 8, 128>}]} {
    %c0_i32 = arith.constant 0 : i32
    %0 = arith.cmpi eq, %arg1, %c0_i32 : i32
    %c0_i32_0 = arith.constant 0 : i32
    %1 = arith.cmpi eq, %arg2, %c0_i32_0 : i32
    %2 = arith.andi %0, %1 : i1
    %3 = arith.extui %2 : i1 to i32
    %c0_i32_1 = arith.constant 0 : i32
    %4 = arith.cmpi ne, %3, %c0_i32_1 : i32
    scf.if %4 {
      %c0_23 = arith.constant 0 : index
      %c0_24 = arith.constant 0 : index
      %34 = vector.load %arg3[%c0_23, %c0_24] : memref<8x128xf32, #tpu.memory_space<vmem>>, vector<8x128xf32>
      %c0_25 = arith.constant 0 : index
      %c0_26 = arith.constant 0 : index
      %35 = vector.load %arg8[%c0_25, %c0_26] : memref<8x128xf32, #tpu.memory_space<vmem>>, vector<8x128xf32>
      tpu.vector_store %arg8[%c0_25, %c0_26], %34 {strides = array<i32>} : memref<8x128xf32, #tpu.memory_space<vmem>>, vector<8x128xf32>,
    } else {
    }
    %c0_i32_2 = arith.constant 0 : i32
    %5 = arith.cmpi eq, %arg2, %c0_i32_2 : i32
    %6 = arith.extui %5 : i1 to i32
    %c0_i32_3 = arith.constant 0 : i32
    %7 = arith.cmpi ne, %6, %c0_i32_3 : i32
    scf.if %7 {
      %c0_23 = arith.constant 0 : index
      %c0_24 = arith.constant 0 : index
      %34 = vector.load %arg8[%c0_23, %c0_24] : memref<8x128xf32, #tpu.memory_space<vmem>>, vector<8x128xf32>
      %cst_25 = arith.constant dense<0.000000e+00> : vector<8xf32>
      %35 = vector.multi_reduction <add>, %34, %cst_25 [1] : vector<8x128xf32> to vector<8xf32>
      %36 = vector.shape_cast %35 : vector<8xf32> to vector<8x1xf32>
      %37 = arith.mulf %34, %34 : vector<8x128xf32>
      %cst_26 = arith.constant dense<0.000000e+00> : vector<8xf32>
      %38 = vector.multi_reduction <add>, %37, %cst_26 [1] : vector<8x128xf32> to vector<8xf32>
      %39 = vector.shape_cast %38 : vector<8xf32> to vector<8x1xf32>
      %cst_27 = arith.constant 3.125000e-02 : f32
      %40 = vector.broadcast %cst_27 : f32 to vector<8x1xf32>
      %41 = arith.mulf %36, %40 : vector<8x1xf32>
      %cst_28 = arith.constant 3.125000e-02 : f32
      %42 = vector.broadcast %cst_28 : f32 to vector<8x1xf32>
      %43 = arith.mulf %39, %42 : vector<8x1xf32>
      %44 = arith.mulf %41, %41 : vector<8x1xf32>
      %45 = arith.subf %43, %44 : vector<8x1xf32>
      %cst_29 = arith.constant 0.000000e+00 : f32
      %46 = vector.broadcast %cst_29 : f32 to vector<8x1xf32>
      %47 = arith.maximumf %45, %46 : vector<8x1xf32>
      %c0_30 = arith.constant 0 : index
      %c0_31 = arith.constant 0 : index
      %c0_32 = arith.constant 0 : index
      %48 = vector.load %arg4[%c0_30, %c0_31, %c0_32] : memref<1x3x128xf32, #tpu.memory_space<vmem>>, vector<1x3x128xf32>
      %49 = vector.shape_cast %48 : vector<1x3x128xf32> to vector<3x128xf32>
      %50 = vector.extract_strided_slice %49 {offsets = [0, 0], sizes = [1, 128], strides = [1, 1]} : vector<3x128xf32> to vector<1x128xf32>
      %51 = vector.extract_strided_slice %49 {offsets = [1, 0], sizes = [1, 128], strides = [1, 1]} : vector<3x128xf32> to vector<1x128xf32>
      %52 = vector.broadcast %41 : vector<8x1xf32> to vector<8x128xf32>
      %53 = arith.subf %34, %52 : vector<8x128xf32>
      %cst_33 = arith.constant 9.99999974E-6 : f32
      %54 = vector.broadcast %cst_33 : f32 to vector<8x1xf32>
      %55 = arith.addf %47, %54 : vector<8x1xf32>
      %56 = math.rsqrt %55 : vector<8x1xf32>
      %57 = vector.broadcast %56 : vector<8x1xf32> to vector<8x128xf32>
      %58 = arith.mulf %53, %57 : vector<8x128xf32>
      %59 = vector.broadcast %50 : vector<1x128xf32> to vector<8x128xf32>
      %60 = arith.mulf %58, %59 : vector<8x128xf32>
      %61 = vector.broadcast %51 : vector<1x128xf32> to vector<8x128xf32>
      %62 = arith.addf %60, %61 : vector<8x128xf32>
      %c0_34 = arith.constant 0 : index
      %c0_35 = arith.constant 0 : index
      %63 = vector.load %arg9[%c0_34, %c0_35] : memref<8x128xf32, #tpu.memory_space<vmem>>, vector<8x128xf32>
      tpu.vector_store %arg9[%c0_34, %c0_35], %62 {strides = array<i32>} : memref<8x128xf32, #tpu.memory_space<vmem>>, vector<8x128xf32>,
    } else {
    }
    %c0 = arith.constant 0 : index
    %c0_4 = arith.constant 0 : index
    %8 = vector.load %arg9[%c0, %c0_4] : memref<8x128xf32, #tpu.memory_space<vmem>>, vector<8x128xf32>
    %c0_5 = arith.constant 0 : index
    %c0_6 = arith.constant 0 : index
    %c0_7 = arith.constant 0 : index
    %9 = vector.load %arg5[%c0_5, %c0_6, %c0_7] : memref<1x128x128xf32, #tpu.memory_space<vmem>>, vector<1x128x128xf32>
    %10 = vector.shape_cast %9 : vector<1x128x128xf32> to vector<128x128xf32>
    %cst = arith.constant dense<0.000000e+00> : vector<8x128xf32>
    %11 = tpu.matmul %8, %10, %cst {dimension_numbers = #tpu.dot_dimension_numbers<[1], [0], [0], [1], [0, 0, 1, 1], [], []>} : vector<8x128xf32>, vector<128x128xf32>, vector<8x128xf32> -> vector<8x128xf32>
    %cst_8 = arith.constant 5.000000e-01 : f32
    %12 = vector.broadcast %cst_8 : f32 to vector<8x128xf32>
    %13 = arith.mulf %12, %11 : vector<8x128xf32>
    %cst_9 = arith.constant 0.707106769 : f32
    %14 = vector.broadcast %cst_9 : f32 to vector<8x128xf32>
    %15 = arith.mulf %11, %14 : vector<8x128xf32>
    %16 = math.erf %15 : vector<8x128xf32>
    %cst_10 = arith.constant 1.000000e+00 : f32
    %17 = vector.broadcast %cst_10 : f32 to vector<8x128xf32>
    %18 = arith.addf %17, %16 : vector<8x128xf32>
    %19 = arith.mulf %13, %18 : vector<8x128xf32>
    %c0_11 = arith.constant 0 : index
    %c0_12 = arith.constant 0 : index
    %20 = vector.load %arg8[%c0_11, %c0_12] : memref<8x128xf32, #tpu.memory_space<vmem>>, vector<8x128xf32>
    %c0_13 = arith.constant 0 : index
    %c0_14 = arith.constant 0 : index
    %c0_15 = arith.constant 0 : index
    %21 = vector.load %arg6[%c0_13, %c0_14, %c0_15] : memref<1x128x128xf32, #tpu.memory_space<vmem>>, vector<1x128x128xf32>
    %22 = vector.shape_cast %21 : vector<1x128x128xf32> to vector<128x128xf32>
    %cst_16 = arith.constant dense<0.000000e+00> : vector<8x128xf32>
    %23 = tpu.matmul %19, %22, %cst_16 {dimension_numbers = #tpu.dot_dimension_numbers<[1], [0], [0], [1], [0, 0, 1, 1], [], []>} : vector<8x128xf32>, vector<128x128xf32>, vector<8x128xf32> -> vector<8x128xf32>
    %24 = arith.addf %20, %23 : vector<8x128xf32>
    %c0_17 = arith.constant 0 : index
    %c0_18 = arith.constant 0 : index
    %25 = vector.load %arg8[%c0_17, %c0_18] : memref<8x128xf32, #tpu.memory_space<vmem>>, vector<8x128xf32>
    tpu.vector_store %arg8[%c0_17, %c0_18], %24 {strides = array<i32>} : memref<8x128xf32, #tpu.memory_space<vmem>>, vector<8x128xf32>,
    %c0_i32_19 = arith.constant 0 : i32
    %26 = arith.cmpi eq, %arg2, %c0_i32_19 : i32
    %27 = arith.extui %26 : i1 to i32
    %c0_i32_20 = arith.constant 0 : i32
    %28 = arith.cmpi ne, %27, %c0_i32_20 : i32
    scf.if %28 {
      %c0_23 = arith.constant 0 : index
      %c0_24 = arith.constant 0 : index
      %34 = vector.load %arg8[%c0_23, %c0_24] : memref<8x128xf32, #tpu.memory_space<vmem>>, vector<8x128xf32>
      %c0_25 = arith.constant 0 : index
      %c0_26 = arith.constant 0 : index
      %c0_27 = arith.constant 0 : index
      %35 = vector.load %arg4[%c0_25, %c0_26, %c0_27] : memref<1x3x128xf32, #tpu.memory_space<vmem>>, vector<1x3x128xf32>
      %36 = vector.shape_cast %35 : vector<1x3x128xf32> to vector<3x128xf32>
      %37 = vector.extract_strided_slice %36 {offsets = [2, 0], sizes = [1, 128], strides = [1, 1]} : vector<3x128xf32> to vector<1x128xf32>
      %38 = vector.broadcast %37 : vector<1x128xf32> to vector<8x128xf32>
      %39 = arith.addf %34, %38 : vector<8x128xf32>
      %c0_28 = arith.constant 0 : index
      %c0_29 = arith.constant 0 : index
      %40 = vector.load %arg8[%c0_28, %c0_29] : memref<8x128xf32, #tpu.memory_space<vmem>>, vector<8x128xf32>
      tpu.vector_store %arg8[%c0_28, %c0_29], %39 {strides = array<i32>} : memref<8x128xf32, #tpu.memory_space<vmem>>, vector<8x128xf32>,
    } else {
    }
    %c1_i32 = arith.constant 1 : i32
    %29 = arith.cmpi eq, %arg1, %c1_i32 : i32
    %c0_i32_21 = arith.constant 0 : i32
    %30 = arith.cmpi eq, %arg2, %c0_i32_21 : i32
    %31 = arith.andi %29, %30 : i1
    %32 = arith.extui %31 : i1 to i32
    %c0_i32_22 = arith.constant 0 : i32
    %33 = arith.cmpi ne, %32, %c0_i32_22 : i32
    scf.if %33 {
      %c0_23 = arith.constant 0 : index
      %c0_24 = arith.constant 0 : index
      %34 = vector.load %arg8[%c0_23, %c0_24] : memref<8x128xf32, #tpu.memory_space<vmem>>, vector<8x128xf32>
      %c0_25 = arith.constant 0 : index
      %c0_26 = arith.constant 0 : index
      %35 = vector.load %arg7[%c0_25, %c0_26] : memref<8x128xf32, #tpu.memory_space<vmem>>, vector<8x128xf32>
      tpu.vector_store %arg7[%c0_25, %c0_26], %34 {strides = array<i32>} : memref<8x128xf32, #tpu.memory_space<vmem>>, vector<8x128xf32>,
    } else {
    }
    return
  }
  func.func @transform_0(%arg0: i32, %arg1: i32, %arg2: i32) -> (i32, i32) {
    %c0_i32 = arith.constant 0 : i32
    %c0_i32_0 = arith.constant 0 : i32
    return %arg0, %c0_i32 : i32, i32
  }
  func.func @transform_1(%arg0: i32, %arg1: i32, %arg2: i32) -> (i32, i32, i32) {
    %c0_i32 = arith.constant 0 : i32
    %c0_i32_0 = arith.constant 0 : i32
    %c0_i32_1 = arith.constant 0 : i32
    return %arg1, %c0_i32, %c0_i32_0 : i32, i32, i32
  }
  func.func @transform_2(%arg0: i32, %arg1: i32, %arg2: i32) -> (i32, i32, i32) {
    %c0_i32 = arith.constant 0 : i32
    %c0_i32_0 = arith.constant 0 : i32
    return %arg1, %c0_i32, %arg2 : i32, i32, i32
  }
  func.func @transform_3(%arg0: i32, %arg1: i32, %arg2: i32) -> (i32, i32, i32) {
    %c0_i32 = arith.constant 0 : i32
    %c0_i32_0 = arith.constant 0 : i32
    return %arg1, %arg2, %c0_i32 : i32, i32, i32
  }
  func.func @transform_4(%arg0: i32, %arg1: i32, %arg2: i32) -> (i32, i32) {
    %c0_i32 = arith.constant 0 : i32
    %c0_i32_0 = arith.constant 0 : i32
    return %arg0, %c0_i32 : i32, i32
  }
}

</mosaic_0001>

<bundles_post_ra>
// kernel: _forward_jit.1
= control target key start
LH: loop header
LB: loop body
LE: loop exit
PB: predicated region body
PF: predicated region fallthrough
CT: control target
= control target key end

     0   :  { %9 = vsyncpa [#allocation5], 0  ;;  %s1390_s0 = inlined_call_operand.vmem [shape: f32[16,128], index: 0, kind: input, shape index: {}, may-alias: {0,4}]   ;;  %s1391_s1 = inlined_call_operand.vmem [shape: f32[2,3,128], index: 1, kind: input, shape index: {}]   ;;  %s1392_s2 = inlined_call_operand.hbm [shape: f32[2,128,128], index: 2, kind: input, shape index: {}]   ;;  %s1393_s3 = inlined_call_operand.hbm [shape: f32[2,128,128], index: 3, kind: input, shape index: {}]   ;;  %s1394_s4 = inlined_call_operand.vmem [shape: f32[16,128], index: 4, kind: output, shape index: {}, may-alias: {0,4}]  }
   0x1   :  { %11 = vsyncpa [#allocation5 + $0x1], 0 }
   0x2   :  { %12 = vsyncpa [#allocation7], 0 }
   0x3   :  { %14 = vsyncpa [#allocation7 + $0x1], 0  ;;  %s1110_s15 = smov 0   ;;  %s1112_s16 = smov 0  }
   0x4   :  { %s1114_s17 = smov 0   ;;  %s1116_s18 = smov 0  }
   0x5   :  { %s1118_s19 = smov 0   ;;  %s1120_s20 = smov 0  }
   0x6   :  { %s1122_s21 = smov 0   ;;  %s1124_s22 = smov 0  }
   0x7 LB: > { %s685_s23 = sadd.s32 4294967295, %s1076_s22   ;;  %s35_s24 = sadd.s32 1, %s1068_s20  ;;  %s1076_s22 = sphi %s1124_s22, %s20_s22   ;;  %s1072_s21 = sphi %s1122_s21, %s1409_s21   ;;  %s1068_s20 = sphi %s1120_s20, %s1408_s20   ;;  %s1064_s19 = sphi %s1118_s19, %s1407_s19   ;;  %s1060_s18 = sphi %s1116_s18, %s1406_s18   ;;  %s1056_s17 = sphi %s1114_s17, %s1405_s17   ;;  %s1052_s16 = sphi %s1112_s16, %s1404_s16   ;;  %s1048_s15 = sphi %s1110_s15, %s1403_s15  }
   0x8   : > { %p37_p0 = scmp.ge.s32.totalorder %s35_s24, 2  ;;  %s39_s25 = sadd.s32 1, %s1072_s21 }
   0x9   : > { %s100_s26 = sadd.s32 1, %s1056_s17  ;;  %p107_p1 = scmp.ne.s32.totalorder %s1056_s17, %s1052_s16 }
   0xa   : > { %s1411_s24 = smov (%p37_p0, %s35_s24), 0  ;;  %s1413_s25 = smov (!%p37_p0, %s39_s25), %s1072_s21 }
   0xb   : > { %s95_s27 = ssub.s32 %s1068_s20, %s1411_s24  ;;  %p108_p2 = scmp.eq.s32.totalorder %s1076_s22, 0 }
   0xc   : > { %p41_p3 = scmp.ge.s32.totalorder %s1413_s25, 2  ;;  %p98_p4 = scmp.eq.s32.totalorder %s95_s27, 0 }
   0xd   : > { %p1160_p5 = por %p108_p2, %p107_p1  ;;  %p113_p6 = scmp.ne.s32.totalorder %s1052_s16, %s1048_s15 }
   0xe   : > { %s1415_s25 = smov (%p41_p3, %s1413_s25), 0  ;;  %p114_p7 = scmp.eq.s32.totalorder %s685_s23, 0 }
   0xf   : > { %s1168_s29 = scalar_select %p98_p4, %s1056_s17, %s100_s26  }
  0x10   : > { %p872_p8 = scmp.lt.s32.totalorder %s1076_s22, 4  ;;  %s1172_s30 = sand.u32 1, %s1056_s17  }
  0x11   : > { %p1174_p9 = por %p114_p7, %p113_p6  ;;  %s689_s6 = sshll.u32 %s1172_s30, 7 }
  0x12   : > { %s705_s7 = sshll.u32 %s1068_s20, 11  ;;  %s209_s11 = scalar_lea.vmem [#allocation4], %s689_s6 }
  0x13   : > { %s1398_s5 = scalar_select %p1174_p9, 1, 0 }
  0x14   : > { %s1185_s10 = scalar_lea.hbm %s1392_s2, %s705_s7  ;;  %s217_s12 = sshll.u32 %s209_s11, 4  ;;  %s1195_s12 = int_to_ptr.vmem [resolvable:$true] %s217_s12 }
  0x15   : > { %p1191_p10 = pnand %p872_p8, %p1160_p5  ;;  %s206_s14 = scalar_lea.sflag [#allocation5], %s1172_s30 }
  0x16   : > { %s946_s15 = scalar_lea.hbm %s1185_s10, 2048  ;;  %s951_s27 = scalar_lea.hbm %s1392_s2, 4096 }
  0x17   : > { %p947_p11 = scmp.ne.s32.totalorder %s1185_s10, %s946_s15  ;;  %p948_p12 = pneg %p1191_p10 }
  0x18   : > { %p952_p1 = scmp.lt.u32.totalorder %s1185_s10, %s1392_s2  ;;  %p953_p2 = scmp.lt.u32.totalorder %s951_s27, %s946_s15 }
  0x19   : > { %p949_p13 = pnand %p948_p12, %p947_p11  ;;  %p955_p4 = scmp.lt.u32.totalorder %s946_s15, %s1185_s10 }
  0x1a   : > { %p954_p3 = por %p953_p2, %p952_p1 }
  0x1b   : > { %p950_p0 = pneg %p949_p13 }
  0x1c   : > { %p956_p5 = por %p955_p4, %p954_p3 }
  0x1e   : > { %p957_p6 = pnand %p956_p5, %p950_p0 }
  0x20   : > { %960 = shalt.err (!%p957_p6)
}
  0x21   : > { %s961_s9 = scalar_lea.vmem %s1195_s12, 2048  ;;  %s1078_s11 = smov [#allocation4]  }
  0x22   : > { %p962_p7 = scmp.ne.s32.totalorder %s1195_s12, %s961_s9  ;;  %s966_s23 = sshll.u32 %s1078_s11, 4  ;;  %s967_s23 = int_to_ptr.vmem [resolvable:$false] %s966_s23 }
  0x23   : > { %s968_s26 = scalar_lea.vmem %s967_s23, 4096  ;;  %p969_p13 = scmp.lt.s32.totalorder %s1195_s12, %s967_s23 }
  0x24   : > { %p964_p8 = pnand %p962_p7, %p948_p12  ;;  %p970_p1 = scmp.lt.s32.totalorder %s968_s26, %s961_s9 }
  0x26   : > { %p965_p11 = pneg %p964_p8  ;;  %p971_p2 = por %p970_p1, %p969_p13 }
  0x28   : > { %p972_p3 = pnand %p971_p2, %p965_p11 }
  0x2a   : > { %975 = shalt.err (!%p972_p3)
}
  0x2b   : > { %s1395_s15 = smov 128   ;;  %s1080_s27 = smov 8  }
  0x2c   : > { %868 = dma.hbm_to_vmem [thread:$0]  (!%p1191_p10), %s1185_s10, 2048, %s1195_s12, %s206_s14, %s1395_s15, %s1395_s15, %s1080_s27  }
  0x2d   : > { %p695_p0 = scmp.ge.s32.totalorder %s1076_s22, 1  ;;  %p248_p4 = scmp.lt.s32.totalorder %s1076_s22, 5 }
  0x2e   : > { %s1239_s11 = scalar_lea.hbm %s1393_s3, %s705_s7  ;;  %s231_s23 = scalar_lea.vmem [#allocation6], %s689_s6 }
  0x2f   : > { %p1230_p5 = pnand %p695_p0, %p248_p4  ;;  %s240_s26 = sshll.u32 %s231_s23, 4  ;;  %s1243_s26 = int_to_ptr.vmem [resolvable:$true] %s240_s26 }
  0x30   : > { %s228_s10 = scalar_lea.sflag [#allocation7], %s1172_s30  ;;  %s976_s12 = scalar_lea.hbm %s1239_s11, 2048 }
  0x31   : > { %p977_p6 = scmp.ne.s32.totalorder %s1239_s11, %s976_s12  ;;  %s981_s7 = scalar_lea.hbm %s1393_s3, 4096 }
  0x32   : > { %p982_p11 = scmp.lt.u32.totalorder %s1239_s11, %s1393_s3  ;;  %p983_p13 = scmp.lt.u32.totalorder %s981_s7, %s976_s12 }
  0x33   : > { %p979_p7 = pnand %p977_p6, %p948_p12  ;;  %p985_p2 = scmp.lt.u32.totalorder %s976_s12, %s1239_s11 }
  0x34   : > { %p984_p1 = por %p983_p13, %p982_p11 }
  0x35   : > { %p980_p8 = pneg %p979_p7 }
  0x36   : > { %p986_p3 = por %p985_p2, %p984_p1 }
  0x38   : > { %p987_p0 = pnand %p986_p3, %p980_p8 }
  0x3a   : > { %990 = shalt.err (!%p987_p0)
}
  0x3b   : > { %s991_s6 = scalar_lea.vmem %s1243_s26, 2048  ;;  %s1081_s23 = smov [#allocation6]  }
  0x3c   : > { %p992_p4 = scmp.ne.s32.totalorder %s1243_s26, %s991_s6  ;;  %s996_s14 = sshll.u32 %s1081_s23, 4  ;;  %s997_s14 = int_to_ptr.vmem [resolvable:$false] %s996_s14 }
  0x3d   : > { %s998_s15 = scalar_lea.vmem %s997_s14, 4096  ;;  %p999_p9 = scmp.lt.s32.totalorder %s1243_s26, %s997_s14 }
  0x3e   : > { %p994_p6 = pnand %p992_p4, %p948_p12  ;;  %p1000_p11 = scmp.lt.s32.totalorder %s998_s15, %s991_s6 }
  0x40   : > { %p995_p7 = pneg %p994_p6  ;;  %p1001_p13 = por %p1000_p11, %p999_p9 }
  0x42   : > { %p1002_p1 = pnand %p1001_p13, %p995_p7 }
  0x44   : > { %1005 = shalt.err (!%p1002_p1)
}
  0x45   : > { %s1401_s12 = smov 128   ;;  %252 = sbr.rel (%p1230_p5) target bundleno = 719 (0x2cf), region = 36 }
  0x46   : > { %871 = dma.hbm_to_vmem [thread:$0]  (!%p1191_p10), %s1239_s11, 2048, %s1243_s26, %s228_s10, %s1401_s12, %s1401_s12, %s1080_s27  }
  0x47   : > { %s254_s8 = sand.u32 (!%p1230_p5), 1, %s1052_s16   ;;  %p1402_p9 = scmp.ne.s32.totalorder (!%p1230_p5), %s1398_s5, 0 }
  0x48   : > { %s696_s7 = sshll.u32 (!%p1230_p5), %s254_s8, 7  ;;  %s255_s9 = scalar_lea.sflag (!%p1230_p5), [#allocation5], %s254_s8 }
  0x49   : > { %s1277_s6 = scalar_lea.vmem (!%p1230_p5), [#allocation4], %s696_s7 }
  0x4c   : > { %1039 = dma.done.wait (%p1402_p9), %s255_s9, 2048  }
  0x4d   : > { %1041 = vsyncadd (%p1402_p9), %s255_s9, 4294965248  ;;  %s264_s30 = scalar_lea.sflag [#allocation7], %s254_s8  ;;  %s1283_s13 = scalar_lea.vmem [#allocation6], %s696_s7 }
  0x4e   : > { %1043 = dma.done.wait (%p1402_p9), %s264_s30, 2048  }
  0x4f   : > { %1045 = vsyncadd (%p1402_p9), %s264_s30, 4294965248  ;;  %p304_p10 = scmp.lt.s32.totalorder %s1064_s19, 1  ;;  %p308_p12 = scmp.lt.s32.totalorder %s1060_s18, 1 }
  0x50   : > { %p317_p5 = scmp.eq.s32.totalorder %s1060_s18, 0 }
  0x51   : > { %s1417_s19 = smov (!%p304_p10, %s1064_s19), 1 }
  0x52   : > { %s309_s27 = scalar_select %p308_p12, %s1060_s18, 1 }
  0x53   : > { %s698_s28 = sshll.u32 %s1417_s19, 3  ;;  %322 = sbr.rel (!%p317_p5) target bundleno = 90 (0x5a), region = 48 }
  0x54   : > { %s307_s10 = scalar_lea.vmem %s1390_s0, %s698_s28  ;;  %s699_s23 = sshll.u32 %s309_s27, 2 }
  0x55   : > { %s1300_s5 = scalar_lea.vmem %s1391_s1, %s699_s23  ;;  %s1305_s7 = scalar_lea.vmem %s1394_s4, %s698_s28  ;;  %v323_v0 = vld [vmem:[%s307_s10] sm:$0xff] (%p317_p5) }
  0x56   : > { %324 = vst [vmem:[#allocation2] sm:$0xff] (%p317_p5), %v323_v0 }
  0x5a PF: > { %v356_v2 = vld [vmem:[%s1277_s6] sm:$0xff]  ;;  %v357_v3 = vld [vmem:[%s1277_s6 + $0x8] sm:$0xff]  ;;  %v1082_v5 = vmov 0.0|0.0   ;;  %v358_v7 = vld [vmem:[%s1277_s6 + $0x10] sm:$0xff]  ;;  %vm1083_vm0 = vmmov 0   ;;  %v1084_v21 = vmov 0.0   ;;  %v344_v48 = vlaneseq }
  0x5b   : > { %813 = vmatprep.subr.bf16.mxu0 %v1082_v5  ;;  %v814_v6 = vpack.c.bf16 %v357_v3, %v356_v2  ;;  %837 = vmatprep.subr.bf16.mxu1 %v1082_v5  ;;  %v359_v8 = vld [vmem:[%s1277_s6 + $0x18] sm:$0xff]  ;;  %v360_v10 = vld [vmem:[%s1277_s6 + $0x20] sm:$0xff]  ;;  %v361_v11 = vld [vmem:[%s1277_s6 + $0x28] sm:$0xff]  ;;  %p547_p8 = scmp.eq.s32.totalorder %s1060_s18, 1 }
  0x5c   : > { %v817_v9 = vpack.c.bf16 %v359_v8, %v358_v7  ;;  %v820_v12 = vpack.c.bf16 %v361_v11, %v360_v10  ;;  %v362_v13 = vld [vmem:[%s1277_s6 + $0x30] sm:$0xff]  ;;  %v363_v14 = vld [vmem:[%s1277_s6 + $0x38] sm:$0xff]  ;;  %v364_v16 = vld [vmem:[%s1277_s6 + $0x40] sm:$0xff]  ;;  %775 = vmatprep.mubr.msk.f32.mxu0 %vm1083_vm0, %v1084_v21  ;;  %810 = vmatprep.mubr.msk.f32.mxu1 %vm1083_vm0, %v1084_v21  ;;  %v345_v50 = vshrl.u32 %v344_v48, 7 }
  0x5d   : > { %v1307_v1 = vld [vmem:[#allocation2] sm:$0xff]  ;;  %815 = vmatpush3.bf16.msra.mxu0 %v814_v6  ;;  %v823_v15 = vpack.c.bf16 %v363_v14, %v362_v13  ;;  %v365_v17 = vld [vmem:[%s1277_s6 + $0x48] sm:$0xff]  ;;  %v366_v19 = vld [vmem:[%s1277_s6 + $0x50] sm:$0xff] }
  0x5e   : > { %329 = vadd.xlane.f32.xlu0 %v1307_v1  ;;  %v331_v4 = vmul.f32 %v1307_v1, %v1307_v1  ;;  %816 = vmatprep.subr.bf16.mxu0 %v1082_v5  ;;  %v826_v18 = vpack.c.bf16 %v365_v17, %v364_v16  ;;  %v367_v20 = vld [vmem:[%s1277_s6 + $0x58] sm:$0xff]  ;;  %v368_v23 = vld [vmem:[%s1277_s6 + $0x60] sm:$0xff]  ;;  %v369_v24 = vld [vmem:[%s1277_s6 + $0x68] sm:$0xff]  ;;  %v346_v51 = vsub.s32 0, %v345_v50  ;;  %v351_v53 = vsub.s32 1, %v345_v50 }
  0x5f   : > { %v829_v22 = vpack.c.bf16 %v367_v20, %v366_v19  ;;  %v832_v25 = vpack.c.bf16 %v369_v24, %v368_v23  ;;  %v370_v26 = vld [vmem:[%s1277_s6 + $0x70] sm:$0xff]  ;;  %v371_v27 = vld [vmem:[%s1277_s6 + $0x78] sm:$0xff]  ;;  %v448_v29 = vld [vmem:[%s1283_s13] sm:$0xff] }
  0x60   : > { %v835_v28 = vpack.c.bf16 %v371_v27, %v370_v26  ;;  %v449_v30 = vld [vmem:[%s1283_s13 + $0x8] sm:$0xff]  ;;  %v450_v31 = vld [vmem:[%s1283_s13 + $0x10] sm:$0xff]  ;;  %v451_v33 = vld [vmem:[%s1283_s13 + $0x18] sm:$0xff] }
  0x61   : > { %818 = vmatpush3.bf16.msra.mxu0 %v817_v9  ;;  %v838_v32 = vpack.c.bf16 %v449_v30, %v448_v29  ;;  %v841_v34 = vpack.c.bf16 %v451_v33, %v450_v31  ;;  %v452_v35 = vld [vmem:[%s1283_s13 + $0x20] sm:$0xff]  ;;  %v453_v36 = vld [vmem:[%s1283_s13 + $0x28] sm:$0xff]  ;;  %v454_v38 = vld [vmem:[%s1283_s13 + $0x30] sm:$0xff] }
  0x62   : > { %332 = vadd.xlane.f32.xlu0 %v331_v4  ;;  %819 = vmatprep.subr.bf16.mxu0 %v1082_v5  ;;  %v844_v37 = vpack.c.bf16 %v453_v36, %v452_v35  ;;  %v455_v39 = vld [vmem:[%s1283_s13 + $0x38] sm:$0xff]  ;;  %v456_v61 = vld [vmem:[%s1283_s13 + $0x40] sm:$0xff]  ;;  %v457_v62 = vld [vmem:[%s1283_s13 + $0x48] sm:$0xff] }
  0x63   : > { %839 = vmatpush3.bf16.msra.mxu1 %v838_v32  ;;  %v847_v40 = vpack.c.bf16 %v455_v39, %v454_v38  ;;  %v339_v52 = vld [vmem:[%s1300_s5] sm:$0x7]  ;;  %v850_v63 = vpack.c.bf16 %v457_v62, %v456_v61  ;;  %v458_v0 = vld [vmem:[%s1283_s13 + $0x50] sm:$0xff]  ;;  %v460_v4 = vld [vmem:[%s1283_s13 + $0x60] sm:$0xff] }
  0x64   : > { %840 = vmatprep.subr.bf16.mxu1 %v1082_v5  ;;  %v347_v55 = vrot.slane %v339_v52, %v346_v51  ;;  %v352_v58 = vrot.slane %v339_v52, %v351_v53  ;;  %v459_v2 = vld [vmem:[%s1283_s13 + $0x58] sm:$0xff]  ;;  %v461_v6 = vld [vmem:[%s1283_s13 + $0x68] sm:$0xff]  ;;  %v462_v8 = vld [vmem:[%s1283_s13 + $0x70] sm:$0xff] }
  0x65   : > { %821 = vmatpush3.bf16.msra.mxu0 %v820_v12  ;;  %v853_v3 = vpack.c.bf16 %v459_v2, %v458_v0  ;;  %v856_v7 = vpack.c.bf16 %v461_v6, %v460_v4  ;;  %v463_v9 = vld [vmem:[%s1283_s13 + $0x78] sm:$0xff] }
  0x66   : > { %822 = vmatprep.subr.bf16.mxu0 %v1082_v5  ;;  %v859_v10 = vpack.c.bf16 %v463_v9, %v462_v8  ;;  %v540_v19 = vld [vmem:[%s1300_s5] sm:$0x7] }
  0x67   : > { %842 = vmatpush3.bf16.msra.mxu1 %v841_v34 }
  0x68   : > { %843 = vmatprep.subr.bf16.mxu1 %v1082_v5 }
  0x69   : > { %824 = vmatpush3.bf16.msra.mxu0 %v823_v15 }
  0x6a   : > { %825 = vmatprep.subr.bf16.mxu0 %v1082_v5 }
  0x6b   : > { %845 = vmatpush3.bf16.msra.mxu1 %v844_v37 }
  0x6c   : > { %846 = vmatprep.subr.bf16.mxu1 %v1082_v5 }
  0x6d   : > { %827 = vmatpush3.bf16.msra.mxu0 %v826_v18  ;;  %v543_v18 = vsub.s32 2, %v345_v50 }
  0x6e   : > { %828 = vmatprep.subr.bf16.mxu0 %v1082_v5 }
  0x6f   : > { %848 = vmatpush3.bf16.msra.mxu1 %v847_v40  ;;  %v544_v20 = vrot.slane %v540_v19, %v543_v18 }
  0x70   : > { %849 = vmatprep.subr.bf16.mxu1 %v1082_v5 }
  0x71   : > { %830 = vmatpush3.bf16.msra.mxu0 %v829_v22 }
  0x72   : > { %831 = vmatprep.subr.bf16.mxu0 %v1082_v5 }
  0x73   : > { %851 = vmatpush3.bf16.msra.mxu1 %v850_v63 }
  0x74   : > { %852 = vmatprep.subr.bf16.mxu1 %v1082_v5 }
  0x75   : > { %833 = vmatpush3.bf16.msra.mxu0 %v832_v25 }
  0x76   : > { %834 = vmatprep.subr.bf16.mxu0 %v1082_v5 }
  0x77   : > { %854 = vmatpush3.bf16.msra.mxu1 %v853_v3 }
  0x78   : > { %855 = vmatprep.subr.bf16.mxu1 %v1082_v5 }
  0x79   : > { %836 = vmatpush3.bf16.msra.mxu0 %v835_v28 }
  0x7b   : > { %857 = vmatpush3.bf16.msra.mxu1 %v856_v7 }
  0x7c   : > { %858 = vmatprep.subr.bf16.mxu1 %v1082_v5 }
  0x7f   : > { %860 = vmatpush3.bf16.msra.mxu1 %v859_v10 }
  0xeb   : > { %v330_v41 = vpop.xlane.xlu0 %329 }
  0xec   : > { %v334_v42 = vmul.f32 0.03125, %v330_v41 }
  0xee   : > { %v336_v44 = vmul.f32 %v334_v42, %v334_v42  ;;  %v340_v54 = vsub.f32 %v1307_v1, %v334_v42 }
  0xef   : > { %v333_v43 = vpop.xlane.xlu0 %332 }
  0xf0   : > { %v335_v45 = vmul.f32 0.03125, %v333_v43 }
  0xf2   : > { %v337_v46 = vsub.f32 %v335_v45, %v336_v44 }
  0xf4   : > { %v338_v47 = vmax.f32 %v337_v46, 0.0 }
  0xf6   : > { %v341_v49 = vadd.f32 1e-05, %v338_v47 }
  0xf8   : > { %942 = vrsqrt.f32 %v341_v49 }
 0x102   : > { %v943_v56 = vpop.eup %942 }
 0x103   : > { %v343_v57 = vmul.f32 %v943_v56, %v340_v54 }
 0x105   : > { %v348_v59 = vmul.f32 %v347_v55, %v343_v57 }
 0x107   : > { %v353_v60 = vadd.f32 %v352_v58, %v348_v59 }
 0x109   : > { %776 = vmatmul.mubr.f32.vlgmr.msra.gmra.mrb[0].mxu0 %v353_v60 }
 0x1dc   : > { %v438_v11 = vpop.f32.mrb[0].mxu0 }
 0x1dd   : > { %v443_v12 = vmul.f32 0.70710677, %v438_v11  ;;  %v777_v13 = vpop.f32.mrb[1].mxu0  ;;  %v442_v15 = vmul.f32 0.5, %v438_v11 }
 0x1df   : > { %944 = verf.f32 %v443_v12 }
 0x1e9   : > { %v945_v14 = vpop.eup %944 }
 0x1ea   : > { %v445_v16 = vadd.f32 1.0, %v945_v14 }
 0x1ec   : > { %v446_v17 = vmul.f32 %v445_v16, %v442_v15 }
 0x1ee   : > { %811 = vmatmul.mubr.f32.vlgmr.msra.gmra.mrb[0].mxu1 %v446_v17 }
 0x2c0   : > { %551 = sbr.rel (!%p547_p8) target bundleno = 719 (0x2cf), region = 60 }
 0x2c1   : > { %v530_v21 = vpop.f32.mrb[0].mxu1 }
 0x2c2   : > { %v534_v5 = vadd.f32 %v530_v21, %v1307_v1  ;;  %v812_v22 = vpop.f32.mrb[1].mxu1 }
 0x2c4   : > { %v545_v23 = vadd.f32 %v544_v20, %v534_v5 }
 0x2c6   : > { %546 = vst [vmem:[#allocation2] sm:$0xff] %v545_v23 }
 0x2cd   : > { %v552_v24 = vld [vmem:[#allocation2] sm:$0xff] }
 0x2ce   : > { %553 = vst [vmem:[%s1305_s7] sm:$0xff] %v552_v24 }
 0x2cf PF: > { %s20_s22 = sadd.s32 1, %s1076_s22   ;;  %s1403_s15 = smov %s1052_s16 }
 0x2d0   : > { %p17_p2 = scmp.ge.s32.totalorder %s20_s22, 6   ;;  %s1404_s16 = smov %s1056_s17 }
 0x2d1   : > { %s1405_s17 = smov %s1168_s29  ;;  %s1406_s18 = smov %s1068_s20 }
 0x2d2   : > { %s1407_s19 = smov %s1072_s21  ;;  %s1408_s20 = smov %s1411_s24 }
 0x2d3   : > { %s1409_s21 = smov %s1415_s25  ;;  %19 = sbr.rel (!%p17_p2) target bundleno = 7 (0x7), region = 111 }
 0x2da   :  { %573 = vsyncpa [#allocation5], 1 }
 0x2db   :  { %575 = vsyncpa [#allocation5 + $0x1], 1 }
 0x2dc   :  { %576 = vsyncpa [#allocation7], 1 }
 0x2dd   :  { %578 = vsyncpa [#allocation7 + $0x1], 1 }

</bundles_post_ra>
